<compile_context>
chip_gen: v5e
topology: v5e:2x2
jax: 0.10.0
libtpu: 0.0.40
codegen_flags: <defaults>
</compile_context>

<pallas_src>
import functools

import jax
import jax.numpy as jnp
from jax.experimental import pallas as pl
from jax.experimental.pallas import tpu as pltpu

_LANE = 128                      # lane width (last dim of the slab)
_SUB = 8                         # sublane alignment
_MAX_BLOCK_ROWS = 4096           # (4096,128) f32 tile = 2 MiB per input stream
_VMEM_LIMIT = 32 * 1024 * 1024   # worst case live tiles = 16 MiB; safe everywhere


def _detect_num_tensorcores():
    """2 TensorCores on v7x; 1 on v5e/v6e.  Conservative fallback: 1."""
    try:
        kind = str(jax.devices()[0].device_kind).lower()
    except Exception:
        return 1
    return 2 if ("v7" in kind or "7x" in kind) else 1


_NUM_TC = _detect_num_tensorcores()


def _round_up(x, m):
    return ((x + m - 1) // m) * m


# --------------------------------------------------------------------------
# In-kernel helpers
# --------------------------------------------------------------------------
def _fold_8x128(x, n_rows):
    """Reduce (n_rows, 128) -> (8, 128) partials.

    Pure VPU vreg-wise adds when n_rows % 8 == 0 (all multi-block cases).
    The n_rows % 8 != 0 case only happens for a tiny single-block tensor; a
    one-off cross-sublane (XLU) reduce is fine there.
    """
    if n_rows % _SUB == 0:
        return jnp.sum(x.reshape(n_rows // _SUB, _SUB, _LANE), axis=0)
    s = jnp.sum(x, axis=0, keepdims=True)                       # (1, 128)
    sub = jax.lax.broadcasted_iota(jnp.int32, (_SUB, _LANE), 0)
    return jnp.where(sub == 0, jnp.broadcast_to(s, (_SUB, _LANE)), 0.0)


# --------------------------------------------------------------------------
# Kernels — flat (rows, 128) slab path
# --------------------------------------------------------------------------
def _mse_sum_kernel(p_ref, t_ref, acc_ref, *, rows, block_rows, bpc, need_mask):
    """Accumulate partial sums of (p-t)^2 into a resident (1,8,128) block."""
    i = pl.program_id(1)

    @pl.when(i == 0)
    def _():
        acc_ref[...] = jnp.zeros_like(acc_ref)

    d = p_ref[...].astype(jnp.float32) - t_ref[...].astype(jnp.float32)
    sq = d * d

    if need_mask:
        p = pl.program_id(0)
        is_edge = jnp.logical_and(p == pl.num_programs(0) - 1, i == bpc - 1)

        @pl.when(is_edge)
        def _():
            row0 = (p * bpc + i) * block_rows
            gid = row0 + jax.lax.broadcasted_iota(
                jnp.int32, (block_rows, _LANE), 0)
            acc_ref[0] += _fold_8x128(jnp.where(gid < rows, sq, 0.0), block_rows)

        @pl.when(jnp.logical_not(is_edge))
        def _():
            acc_ref[0] += _fold_8x128(sq, block_rows)
    else:
        acc_ref[0] += _fold_8x128(sq, block_rows)


def _mse_wsum_kernel(p_ref, t_ref, w_ref, acc_ref, *wacc_refs,
                     rows, block_rows, bpc, need_mask, with_wsum):
    """Accumulate partial sums of w*(p-t)^2 (and optionally of w, fused)."""
    wacc_ref = wacc_refs[0] if with_wsum else None
    i = pl.program_id(1)

    @pl.when(i == 0)
    def _():
        acc_ref[...] = jnp.zeros_like(acc_ref)
        if with_wsum:
            wacc_ref[...] = jnp.zeros_like(wacc_ref)

    w = w_ref[...].astype(jnp.float32)
    d = p_ref[...].astype(jnp.float32) - t_ref[...].astype(jnp.float32)
    sq = d * d * w

    if need_mask:
        p = pl.program_id(0)
        is_edge = jnp.logical_and(p == pl.num_programs(0) - 1, i == bpc - 1)

        @pl.when(is_edge)
        def _():
            row0 = (p * bpc + i) * block_rows
            gid = row0 + jax.lax.broadcasted_iota(
                jnp.int32, (block_rows, _LANE), 0)
            m = gid < rows
            acc_ref[0] += _fold_8x128(jnp.where(m, sq, 0.0), block_rows)
            if with_wsum:
                wacc_ref[0] += _fold_8x128(jnp.where(m, w, 0.0), block_rows)

        @pl.when(jnp.logical_not(is_edge))
        def _():
            acc_ref[0] += _fold_8x128(sq, block_rows)
            if with_wsum:
                wacc_ref[0] += _fold_8x128(w, block_rows)
    else:
        acc_ref[0] += _fold_8x128(sq, block_rows)
        if with_wsum:
            wacc_ref[0] += _fold_8x128(w, block_rows)


def _mse_map_kernel(p_ref, t_ref, o_ref, *, lw):
    """Elementwise lw * (p - t)^2 (loss_weight folded in)."""
    d = p_ref[...].astype(jnp.float32) - t_ref[...].astype(jnp.float32)
    v = d * d
    if lw != 1.0:
        v = v * lw
    o_ref[...] = v.astype(o_ref.dtype)


def _mse_map_w_kernel(p_ref, t_ref, w_ref, o_ref, *, lw):
    """Elementwise lw * w * (p - t)^2 (loss_weight folded in)."""
    d = p_ref[...].astype(jnp.float32) - t_ref[...].astype(jnp.float32)
    v = d * d * w_ref[...].astype(jnp.float32)
    if lw != 1.0:
        v = v * lw
    o_ref[...] = v.astype(o_ref.dtype)


# --------------------------------------------------------------------------
# Kernels — broadcast-weight (N,1,H,W) path (weight read once per (n, block))
# --------------------------------------------------------------------------
def _mse_bw_reduce_kernel(p_ref, t_ref, w_ref, acc_ref, *wacc_refs,
                          rows_hw, bh, nbh, with_wsum):
    wacc_ref = wacc_refs[0] if with_wsum else None
    n, j, c = pl.program_id(0), pl.program_id(1), pl.program_id(2)

    @pl.when(n + j + c == 0)
    def _():
        acc_ref[...] = jnp.zeros_like(acc_ref)
        if with_wsum:
            wacc_ref[...] = jnp.zeros_like(wacc_ref)

    w = w_ref[0].astype(jnp.float32)
    d = p_ref[0].astype(jnp.float32) - t_ref[0].astype(jnp.float32)
    sq = d * d * w

    if nbh * bh != rows_hw:          # last hw block is ragged
        is_edge = (j == nbh - 1)

        @pl.when(is_edge)
        def _():
            gid = j * bh + jax.lax.broadcasted_iota(jnp.int32, (bh, _LANE), 0)
            m = gid < rows_hw
            acc_ref[0] += _fold_8x128(jnp.where(m, sq, 0.0), bh)
            if with_wsum:
                wacc_ref[0] += _fold_8x128(jnp.where(m, w, 0.0), bh)

        @pl.when(jnp.logical_not(is_edge))
        def _():
            acc_ref[0] += _fold_8x128(sq, bh)
            if with_wsum:
                wacc_ref[0] += _fold_8x128(w, bh)
    else:
        acc_ref[0] += _fold_8x128(sq, bh)
        if with_wsum:
            wacc_ref[0] += _fold_8x128(w, bh)


# --------------------------------------------------------------------------
# Glue: flatten to a lane-dense (rows, 128) slab (copy-free when numel % 128 == 0)
# --------------------------------------------------------------------------
def _flat2d(x):
    flat = x.reshape(-1)
    pad = (-flat.shape[0]) % _LANE
    if pad:
        flat = jnp.pad(flat, (0, pad))   # only for numel not multiple of 128
    return flat.reshape(-1, _LANE)


# --------------------------------------------------------------------------
# pallas_call wrappers — flat path
# --------------------------------------------------------------------------
def _reduce_call(pred2d, target2d, weight2d=None, *, need_wsum=True):
    rows = pred2d.shape[0]
    block_rows = min(_MAX_BLOCK_ROWS, rows)
    total_blocks = pl.cdiv(rows, block_rows)

    num_par = 1
    if _NUM_TC >= 2 and total_blocks >= 2:
        if total_blocks % 2:
            # Re-tile so the block count is even (no duplicate/clamped block).
            br = _round_up(pl.cdiv(rows, total_blocks + 1), _SUB)
            if pl.cdiv(rows, br) % 2 == 0:
                block_rows = br
                total_blocks = pl.cdiv(rows, br)
        if total_blocks % 2 == 0:
            num_par = 2
    bpc = total_blocks // num_par
    need_mask = (total_blocks * block_rows != rows)

    blk = pl.BlockSpec((block_rows, _LANE), lambda p, i: (p * bpc + i, 0))
    acc_spec = pl.BlockSpec((1, _SUB, _LANE), lambda p, i: (p, 0, 0))
    acc_shape = jax.ShapeDtypeStruct((num_par, _SUB, _LANE), jnp.float32)

    if weight2d is None:
        kernel = functools.partial(_mse_sum_kernel, rows=rows,
                                   block_rows=block_rows, bpc=bpc,
                                   need_mask=need_mask)
        ins, in_specs = (pred2d, target2d), (blk, blk)
        out_shape, out_specs = acc_shape, acc_spec
    else:
        kernel = functools.partial(_mse_wsum_kernel, rows=rows,
                                   block_rows=block_rows, bpc=bpc,
                                   need_mask=need_mask, with_wsum=need_wsum)
        ins, in_specs = (pred2d, target2d, weight2d), (blk, blk, blk)
        if need_wsum:
            out_shape, out_specs = (acc_shape, acc_shape), (acc_spec, acc_spec)
        else:
            out_shape, out_specs = acc_shape, acc_spec

    out = pl.pallas_call(
        kernel,
        out_shape=out_shape,
        grid_spec=pltpu.PrefetchScalarGridSpec(
            num_scalar_prefetch=0,
            grid=(num_par, bpc),
            in_specs=in_specs,
            out_specs=out_specs),
        compiler_params=pltpu.CompilerParams(
            dimension_semantics=("parallel", "arbitrary"),
            vmem_limit_bytes=_VMEM_LIMIT),
    )(*ins)

    if weight2d is None or not need_wsum:
        return jnp.sum(out)              # tiny final reduce (<= 2*8*128 f32)
    loss_part, w_part = out
    return jnp.sum(loss_part), jnp.sum(w_part)


def _elementwise_call(pred2d, target2d, weight2d, out_dtype, lw):
    rows = pred2d.shape[0]
    block_rows = min(_MAX_BLOCK_ROWS, rows)
    blk = pl.BlockSpec((block_rows, _LANE), lambda i: (i, 0))

    if weight2d is None:
        kernel = functools.partial(_mse_map_kernel, lw=lw)
        ins, in_specs = (pred2d, target2d), (blk, blk)
    else:
        kernel = functools.partial(_mse_map_w_kernel, lw=lw)
        ins, in_specs = (pred2d, target2d, weight2d), (blk, blk, blk)

    return pl.pallas_call(
        kernel,
        out_shape=jax.ShapeDtypeStruct((rows, _LANE), out_dtype),
        grid_spec=pltpu.PrefetchScalarGridSpec(
            num_scalar_prefetch=0,
            grid=(pl.cdiv(rows, block_rows),),
            in_specs=in_specs,
            out_specs=blk),
        compiler_params=pltpu.CompilerParams(
            dimension_semantics=("parallel",),
            vmem_limit_bytes=_VMEM_LIMIT),
    )(*ins)


# --------------------------------------------------------------------------
# pallas_call wrappers — broadcast-weight (N,1,H,W) path
# --------------------------------------------------------------------------
def _bw_specs(C, bh):
    pt_blk = pl.BlockSpec((1, bh, _LANE), lambda n, j, c: (n * C + c, j, 0))
    # Weight block index is constant across the innermost C axis, so the same
    # VMEM block is re-used and HBM reads of weight stay at size(weight).
    w_blk = pl.BlockSpec((1, bh, _LANE), lambda n, j, c: (n, j, 0))
    return pt_blk, w_blk


def _bw_reduce_call(pred3, target3, weight3, C, *, need_wsum):
    NC, rows_hw, _ = pred3.shape
    N = NC // C
    bh = min(_MAX_BLOCK_ROWS, rows_hw)
    nbh = pl.cdiv(rows_hw, bh)
    pt_blk, w_blk = _bw_specs(C, bh)

    acc_spec = pl.BlockSpec((1, _SUB, _LANE), lambda n, j, c: (0, 0, 0))
    acc_shape = jax.ShapeDtypeStruct((1, _SUB, _LANE), jnp.float32)
    kernel = functools.partial(_mse_bw_reduce_kernel, rows_hw=rows_hw, bh=bh,
                               nbh=nbh, with_wsum=need_wsum)
    if need_wsum:
        out_shape, out_specs = (acc_shape, acc_shape), (acc_spec, acc_spec)
    else:
        out_shape, out_specs = acc_shape, acc_spec

    out = pl.pallas_call(
        kernel,
        out_shape=out_shape,
        grid_spec=pltpu.PrefetchScalarGridSpec(
            num_scalar_prefetch=0,
            grid=(N, nbh, C),
            in_specs=(pt_blk, pt_blk, w_blk),
            out_specs=out_specs),
        compiler_params=pltpu.CompilerParams(
            dimension_semantics=("arbitrary", "arbitrary", "arbitrary"),
            vmem_limit_bytes=_VMEM_LIMIT),
    )(pred3, target3, weight3)

    if need_wsum:
        loss_part, w_part = out
        # w is accumulated once per channel, so this already equals the sum of
        # the weight broadcast to pred's shape (basicsr 'mean' denominator).
        return jnp.sum(loss_part), jnp.sum(w_part)
    return jnp.sum(out)


def _bw_elementwise_call(pred3, target3, weight3, C, out_dtype, lw):
    NC, rows_hw, _ = pred3.shape
    N = NC // C
    bh = min(_MAX_BLOCK_ROWS, rows_hw)
    nbh = pl.cdiv(rows_hw, bh)
    pt_blk, w_blk = _bw_specs(C, bh)

    return pl.pallas_call(
        functools.partial(_mse_map_w_kernel, lw=lw),
        out_shape=jax.ShapeDtypeStruct((NC, rows_hw, _LANE), out_dtype),
        grid_spec=pltpu.PrefetchScalarGridSpec(
            num_scalar_prefetch=0,
            grid=(N, nbh, C),
            in_specs=(pt_blk, pt_blk, w_blk),
            out_specs=pt_blk),
        compiler_params=pltpu.CompilerParams(
            dimension_semantics=("parallel", "parallel", "arbitrary"),
            vmem_limit_bytes=_VMEM_LIMIT),
    )(pred3, target3, weight3)


# --------------------------------------------------------------------------
# Module-equivalent wrapper
# --------------------------------------------------------------------------
class MSELossPallas:
    """JAX/Pallas equivalent of basicir MSELoss (no learnable parameters)."""

    def __init__(self, loss_weight=1.0, reduction='mean'):
        if reduction not in ('none', 'mean', 'sum'):
            raise ValueError(f'Unsupported reduction mode: {reduction}.')
        self.loss_weight = float(loss_weight)
        self.reduction = reduction

    @functools.partial(jax.jit, static_argnums=0)
    def _forward(self, pred, target, weight):
        orig_shape = pred.shape
        n_elem = pred.size
        out_dtype = jnp.result_type(pred.dtype, target.dtype)
        lw = self.loss_weight

        # ---- C==1 weight maps: broadcast inside the kernel, no materialization
        if weight is not None and weight.shape != orig_shape:
            can_bw = (pred.ndim == 4 and weight.ndim == 4
                      and weight.shape[0] == orig_shape[0]
                      and weight.shape[1] == 1
                      and weight.shape[2:] == orig_shape[2:]
                      and (orig_shape[2] * orig_shape[3]) % _LANE == 0)
            if can_bw:
                N, C, H, W = orig_shape
                rows_hw = (H * W) // _LANE
                p3 = pred.reshape(N * C, rows_hw, _LANE)
                t3 = target.reshape(N * C, rows_hw, _LANE)
                w3 = weight.reshape(N, rows_hw, _LANE)
                if self.reduction == 'none':
                    out3 = _bw_elementwise_call(p3, t3, w3, C, out_dtype, lw)
                    return out3.reshape(orig_shape)
                if self.reduction == 'sum':
                    total = _bw_reduce_call(p3, t3, w3, C, need_wsum=False)
                    return (lw * total).astype(out_dtype)
                total, w_sum = _bw_reduce_call(p3, t3, w3, C, need_wsum=True)
                return (lw * total / w_sum).astype(out_dtype)
            # TODO(synk): support general broadcast shapes (non-NCHW, or H*W not
            # a multiple of 128) without materializing the broadcast.
            weight = jnp.broadcast_to(weight, orig_shape)

        # ---- flat (rows, 128) slab path
        p2d = _flat2d(pred)
        t2d = _flat2d(target)
        w2d = _flat2d(weight) if weight is not None else None

        if self.reduction == 'none':
            out2d = _elementwise_call(p2d, t2d, w2d, out_dtype, lw)
            return out2d.reshape(-1)[:n_elem].reshape(orig_shape)

        if w2d is None:
            total = _reduce_call(p2d, t2d, None)
            if self.reduction == 'sum':
                return (lw * total).astype(out_dtype)
            return (lw * total / jnp.float32(n_elem)).astype(out_dtype)

        if self.reduction == 'sum':
            total = _reduce_call(p2d, t2d, w2d, need_wsum=False)
            return (lw * total).astype(out_dtype)
        total, w_sum = _reduce_call(p2d, t2d, w2d, need_wsum=True)
        return (lw * total / w_sum).astype(out_dtype)

    def __call__(self, pred, target, weight=None, **kwargs):
        return self._forward(pred, target, weight)


# --------------------------------------------------------------------------
# Demo / self-check
# --------------------------------------------------------------------------
if __name__ == "__main__":
    key = jax.random.PRNGKey(0)
    k1, k2, k3, k4 = jax.random.split(key, 4)

    N, C, H, W = 2, 4, 16, 16  # NCHW, matching the PyTorch docstring
    pred = jax.random.normal(k1, (N, C, H, W), dtype=jnp.float32)
    target = jax.random.normal(k2, (N, C, H, W), dtype=jnp.float32)
    weight = jax.random.uniform(k3, (N, C, H, W), dtype=jnp.float32)
    weight_c1 = jax.random.uniform(k4, (N, 1, H, W), dtype=jnp.float32)

    d2 = (pred - target) ** 2

    # mean, no weight (default config)
    loss_mean = MSELossPallas(1.0, 'mean')(pred, target)
    jax.block_until_ready(loss_mean)
    assert jnp.allclose(loss_mean, jnp.mean(d2), rtol=1e-5, atol=1e-5)

    # sum
    loss_sum = MSELossPallas(0.5, 'sum')(pred, target)
    jax.block_until_ready(loss_sum)
    assert jnp.allclose(loss_sum, 0.5 * jnp.sum(d2), rtol=1e-5, atol=1e-4)

    # none, with full-shape weight (loss_weight folded in-kernel, dtype kept)
    loss_none = MSELossPallas(2.0, 'none')(pred, target, weight)
    jax.block_until_ready(loss_none)
    assert loss_none.shape == (N, C, H, W) and loss_none.dtype == pred.dtype
    assert jnp.allclose(loss_none, 2.0 * weight * d2, rtol=1e-5, atol=1e-5)

    # mean, with full-shape weight (fused sum(w) denominator)
    loss_wmean = MSELossPallas(1.0, 'mean')(pred, target, weight)
    jax.block_until_ready(loss_wmean)
    assert jnp.allclose(loss_wmean, jnp.sum(weight * d2) / jnp.sum(weight),
                        rtol=1e-5, atol=1e-5)

    # C==1 weight map: in-kernel broadcast path ('none' and 'mean')
    loss_bw_none = MSELossPallas(1.5, 'none')(pred, target, weight_c1)
    jax.block_until_ready(loss_bw_none)
    assert jnp.allclose(loss_bw_none, 1.5 * weight_c1 * d2, rtol=1e-5, atol=1e-5)

    loss_bw_mean = MSELossPallas(1.0, 'mean')(pred, target, weight_c1)
    jax.block_until_ready(loss_bw_mean)
    ref_bw_mean = jnp.sum(weight_c1 * d2) / (jnp.sum(weight_c1) * C)
    assert jnp.allclose(loss_bw_mean, ref_bw_mean, rtol=1e-5, atol=1e-5)

    # ragged numel (not a multiple of 128): pad + tiny-block fallback path
    kr1, kr2 = jax.random.split(jax.random.PRNGKey(2))
    pred_r = jax.random.normal(kr1, (2, 3, 7, 11), dtype=jnp.float32)
    targ_r = jax.random.normal(kr2, (2, 3, 7, 11), dtype=jnp.float32)
    loss_r = MSELossPallas(1.0, 'mean')(pred_r, targ_r)
    jax.block_until_ready(loss_r)
    assert jnp.allclose(loss_r, jnp.mean((pred_r - targ_r) ** 2),
                        rtol=1e-5, atol=1e-5)

    # medium shape exercising the multi-block / edge-mask / megacore-split path
    km1, km2 = jax.random.split(jax.random.PRNGKey(1))
    pred_m = jax.random.normal(km1, (2, 4, 384, 400), dtype=jnp.float32)
    targ_m = jax.random.normal(km2, (2, 4, 384, 400), dtype=jnp.float32)
    loss_m = MSELossPallas(1.0, 'mean')(pred_m, targ_m)
    jax.block_until_ready(loss_m)
    assert jnp.allclose(loss_m, jnp.mean((pred_m - targ_m) ** 2),
                        rtol=1e-5, atol=1e-5)

    print("KERNEL_OK")
</pallas_src>

<mosaic_0001>
module attributes {stable_mosaic.version = 11 : i64} {
  func.func @_mse_sum_kernel(%arg0: i32, %arg1: i32, %arg2: memref<16x128xf32, #tpu.memory_space<vmem>>, %arg3: memref<16x128xf32, #tpu.memory_space<vmem>>, %arg4: memref<1x8x128xf32, #tpu.memory_space<vmem>>) attributes {dimension_semantics = [#tpu.dimension_semantics<parallel>, #tpu.dimension_semantics<arbitrary>], iteration_bounds = array<i64: 1, 1>, scalar_prefetch = 0 : i64, scratch_operands = 0 : i64, tpu.core_type = #tpu.core_type<tc>, window_params = [{transform_indices = @transform_0, window_bounds = array<i64: 16, 128>}, {transform_indices = @transform_1, window_bounds = array<i64: 16, 128>}, {transform_indices = @transform_2, window_bounds = array<i64: 1, 8, 128>}]} {
    %c0_i32 = arith.constant 0 : i32
    %0 = arith.cmpi eq, %arg1, %c0_i32 : i32
    %1 = arith.extui %0 : i1 to i32
    %c0_i32_0 = arith.constant 0 : i32
    %2 = arith.cmpi ne, %1, %c0_i32_0 : i32
    scf.if %2 {
      %cst_10 = arith.constant 0.000000e+00 : f32
      %15 = vector.broadcast %cst_10 : f32 to vector<1x8x128xf32>
      %c0_11 = arith.constant 0 : index
      %c0_12 = arith.constant 0 : index
      %c0_13 = arith.constant 0 : index
      %16 = vector.load %arg4[%c0_11, %c0_12, %c0_13] : memref<1x8x128xf32, #tpu.memory_space<vmem>>, vector<1x8x128xf32>
      tpu.vector_store %arg4[%c0_11, %c0_12, %c0_13], %15 {strides = array<i32>} : memref<1x8x128xf32, #tpu.memory_space<vmem>>, vector<1x8x128xf32>,
    } else {
    }
    %c0 = arith.constant 0 : index
    %c0_1 = arith.constant 0 : index
    %3 = vector.load %arg2[%c0, %c0_1] : memref<16x128xf32, #tpu.memory_space<vmem>>, vector<16x128xf32>
    %c0_2 = arith.constant 0 : index
    %c0_3 = arith.constant 0 : index
    %4 = vector.load %arg3[%c0_2, %c0_3] : memref<16x128xf32, #tpu.memory_space<vmem>>, vector<16x128xf32>
    %5 = arith.subf %3, %4 : vector<16x128xf32>
    %6 = arith.mulf %5, %5 : vector<16x128xf32>
    %c0_4 = arith.constant 0 : index
    %c0_5 = arith.constant 0 : index
    %c0_6 = arith.constant 0 : index
    %7 = vector.load %arg4[%c0_4, %c0_5, %c0_6] : memref<1x8x128xf32, #tpu.memory_space<vmem>>, vector<1x8x128xf32>
    %8 = vector.shape_cast %7 : vector<1x8x128xf32> to vector<8x128xf32>
    %9 = vector.shape_cast %6 : vector<16x128xf32> to vector<2x8x128xf32>
    %cst = arith.constant dense<0.000000e+00> : vector<8x128xf32>
    %10 = vector.multi_reduction <add>, %9, %cst [0] : vector<2x8x128xf32> to vector<8x128xf32>
    %11 = arith.addf %8, %10 : vector<8x128xf32>
    %c0_7 = arith.constant 0 : index
    %c0_8 = arith.constant 0 : index
    %c0_9 = arith.constant 0 : index
    %12 = vector.load %arg4[%c0_7, %c0_8, %c0_9] : memref<1x8x128xf32, #tpu.memory_space<vmem>>, vector<1x8x128xf32>
    %13 = vector.shape_cast %12 : vector<1x8x128xf32> to vector<8x128xf32>
    %14 = vector.shape_cast %11 : vector<8x128xf32> to vector<1x8x128xf32>
    tpu.vector_store %arg4[%c0_7, %c0_8, %c0_9], %14 {strides = array<i32>} : memref<1x8x128xf32, #tpu.memory_space<vmem>>, vector<1x8x128xf32>,
    return
  }
  func.func @transform_0(%arg0: i32, %arg1: i32) -> (i32, i32) {
    %c1_i32 = arith.constant 1 : i32
    %0 = arith.muli %arg0, %c1_i32 : i32
    %1 = arith.addi %0, %arg1 : i32
    %c0_i32 = arith.constant 0 : i32
    %c0_i32_0 = arith.constant 0 : i32
    return %1, %c0_i32 : i32, i32
  }
  func.func @transform_1(%arg0: i32, %arg1: i32) -> (i32, i32) {
    %c1_i32 = arith.constant 1 : i32
    %0 = arith.muli %arg0, %c1_i32 : i32
    %1 = arith.addi %0, %arg1 : i32
    %c0_i32 = arith.constant 0 : i32
    %c0_i32_0 = arith.constant 0 : i32
    return %1, %c0_i32 : i32, i32
  }
  func.func @transform_2(%arg0: i32, %arg1: i32) -> (i32, i32, i32) {
    %c0_i32 = arith.constant 0 : i32
    %c0_i32_0 = arith.constant 0 : i32
    %c0_i32_1 = arith.constant 0 : i32
    return %arg0, %c0_i32, %c0_i32_0 : i32, i32, i32
  }
}

</mosaic_0001>

<bundles_post_ra>
// kernel: _forward.1
= control target key start
LH: loop header
LB: loop body
LE: loop exit
PB: predicated region body
PF: predicated region fallthrough
CT: control target
= control target key end

     0   :  { %s119_s0 = inlined_call_operand.vmem [shape: f32[16,128], index: 0, kind: input, shape index: {}]   ;;  %s120_s1 = inlined_call_operand.vmem [shape: f32[16,128], index: 1, kind: input, shape index: {}]   ;;  %s121_s2 = inlined_call_operand.vmem [shape: f32[1,8,128], index: 2, kind: output, shape index: {}]  }
   0x1   :  { %v60_v0 = vld [vmem:[%s119_s0] sm:$0xff]  ;;  %v61_v1 = vld [vmem:[%s119_s0 + $0x8] sm:$0xff] }
   0x2   :  { %v62_v2 = vld [vmem:[%s120_s1] sm:$0xff]  ;;  %v63_v3 = vld [vmem:[%s120_s1 + $0x8] sm:$0xff] }
   0x3   :  { %v64_v4 = vsub.f32 %v60_v0, %v62_v2  ;;  %v65_v5 = vsub.f32 %v61_v1, %v63_v3 }
   0x5   :  { %v66_v6 = vmul.f32 %v64_v4, %v64_v4  ;;  %v67_v7 = vmul.f32 %v65_v5, %v65_v5 }
   0x7   :  { %v69_v8 = vadd.f32 %v67_v7, %v66_v6 }
   0x9   :  { %71 = vst [vmem:[%s121_s2] sm:$0xff] %v69_v8 }

</bundles_post_ra>
